<compile_context>
chip_gen: v7x
topology: tpu7x:2x2x1
jax: 0.10.0
libtpu: 0.0.40
codegen_flags: <defaults>
</compile_context>

<pallas_src>
import jax
import jax.numpy as jnp
from jax import lax
from jax.experimental import pallas as pl
from jax.experimental.pallas import tpu as pltpu


_LANES = 128
_SUBLANES = 8
_DEFAULT_MAX_TILE_ROWS = 2048       # 2048 x 128 x 4 B = 1 MiB per f32 input tile
_NUM_CORES = 2                      # leading "parallel" grid axis (v7x megacore)
_LN2 = 0.6931471805599453


def _round_up(a, b):
    return (a + b - 1) // b * b


def _sublane_quantum(dtype):
    # Native sublane tiling: 8 rows for 32-bit, 16 for 16-bit, 32 for 8-bit.
    return max(_SUBLANES, 32 // jnp.dtype(dtype).itemsize)


def _make_loss_kernel(rows, tile_rows, tiles_per_core):
    """Builds the tiled-reduction kernel. `rows`, `tile_rows`, `tiles_per_core`
    are static Python ints."""
    lanes = _LANES
    chunks = tile_rows // _SUBLANES

    def kernel(labels_ref, logits_ref, pos_ref, totc_ref, tot_ref, cnt_ref):
        c = pl.program_id(0)          # core (parallel axis)
        i = pl.program_id(1)          # tile within this core (arbitrary axis)

        @pl.when(i == 0)
        def _init():
            pos_ref[...] = jnp.zeros_like(pos_ref)
            totc_ref[...] = jnp.zeros_like(totc_ref)
            tot_ref[...] = jnp.zeros_like(tot_ref)
            cnt_ref[...] = jnp.zeros_like(cnt_ref)

        # Narrow-dtype labels/logits are upcast in-kernel (free on the VPU);
        # the HBM stream stays at the caller's dtype width.
        y = labels_ref[...].astype(jnp.float32)
        x = logits_ref[...].astype(jnp.float32)

        def _bce(yv, xv):
            # Stable BCE-with-logits; equals BCE(sigmoid(x), y) elementwise,
            # so it serves the pos/neg BCELoss terms and classify_loss2.
            return (jnp.maximum(xv, 0.0) - xv * yv
                    + jnp.log1p(jnp.exp(-jnp.abs(xv))))

        def _vsum(a):
            # (tile_rows,128) -> (chunks,8,128) -> sum over chunks: pure
            # vreg-wise VALU adds; all sublane/lane (XLU) reduction is
            # deferred to the tiny wrapper-side finalize.
            return jnp.sum(a.reshape(chunks, _SUBLANES, lanes), axis=0)

        def _accumulate(bce, posf):
            # nn.BCELoss clamps each log term at -100 -> per-element loss cap
            # of 100 for hard {0,1} labels.  BCEWithLogitsLoss (loss2) has no
            # clamp, so keep clamped and unclamped running totals.
            bce_c = jnp.minimum(bce, 100.0)
            pos_ref[0] += _vsum(bce_c * posf)     # clamped BCE over positives
            totc_ref[0] += _vsum(bce_c)           # clamped BCE over everything
            tot_ref[0] += _vsum(bce)              # unclamped BCE (loss2)
            cnt_ref[0] += _vsum(posf)             # positive count

        blk = c * tiles_per_core + i              # unclamped global tile index
        blk_start = blk * tile_rows
        is_full = blk_start + tile_rows <= rows

        @pl.when(is_full)
        def _full_tile():
            # Steady-state path: no masks, no iota.
            _accumulate(_bce(y, x), (y >= 0.5).astype(jnp.float32))

        @pl.when(jnp.logical_not(is_full))
        def _ragged_tile():
            # Only the (at most one) partial edge tile and duplicate tiles
            # produced by the clamped index_map pay for the row mask.  Rows
            # beyond `rows` hold stale VMEM contents, so use where() (not a
            # multiply) to guarantee NaN/Inf never leak into the sums.
            valid_rows = jnp.clip(rows - blk_start, 0, tile_rows)
            ridx = lax.broadcasted_iota(jnp.int32, (tile_rows, lanes), 0)
            valid = ridx < valid_rows
            bce = jnp.where(valid, _bce(y, x), 0.0)
            posf = jnp.where(valid & (y >= 0.5), 1.0, 0.0)
            _accumulate(bce, posf)

    return kernel


def loss_forward(prob, labels, logits, train=True,
                 max_tile_rows=_DEFAULT_MAX_TILE_ROWS):
    """Returns (classify_loss, classify_loss2) as 0-d f32 scalars.

    `prob` is accepted for interface parity with the PyTorch module but is not
    streamed: both losses are derived from `logits` assuming
    prob == sigmoid(logits) (true on the training path).  `labels` may be
    bool / int8 / bf16 / f32 - it is upcast inside the kernel.
    """
    del prob      # see module docstring / TODO above
    del train     # both scalars are always returned

    labels_f = labels.reshape(-1)
    logits_f = logits.reshape(-1)
    n = labels_f.shape[0]

    rows = pl.cdiv(n, _LANES)
    pad = rows * _LANES - n
    if pad:
        # Single 128-alignment pad (zeros); corrected analytically below.
        labels_f = jnp.pad(labels_f, (0, pad))
        logits_f = jnp.pad(logits_f, (0, pad))
    y2 = labels_f.reshape(rows, _LANES)
    x2 = logits_f.reshape(rows, _LANES)

    # Tile rows: multiple of the native sublane quantum of the narrowest
    # streamed dtype, shrunk for tiny inputs, capped at ~1-2 MiB f32 tiles.
    q = max(_sublane_quantum(y2.dtype), _sublane_quantum(x2.dtype))
    tile_rows = min(_round_up(max_tile_rows, q), _round_up(max(rows, 1), q))
    num_blocks = pl.cdiv(rows, tile_rows)
    tiles_per_core = pl.cdiv(num_blocks, _NUM_CORES)

    def in_map(c, i):
        # Clamp so duplicate (past-the-end) steps re-read the last valid tile;
        # the kernel masks their contribution to exactly zero.
        return (jnp.minimum(c * tiles_per_core + i, num_blocks - 1), 0)

    in_spec = pl.BlockSpec((tile_rows, _LANES), in_map)
    out_spec = pl.BlockSpec((1, _SUBLANES, _LANES), lambda c, i: (c, 0, 0))
    part_shape = jax.ShapeDtypeStruct((_NUM_CORES, _SUBLANES, _LANES),
                                      jnp.float32)

    # 2 pipeline buffers x (label tile + logit tile) + slack for f32 temps.
    in_tile_bytes = tile_rows * _LANES * (y2.dtype.itemsize + x2.dtype.itemsize)
    vmem_limit = int(2 * in_tile_bytes + (16 << 20))

    kernel = _make_loss_kernel(rows, tile_rows, tiles_per_core)

    pos_p, totc_p, tot_p, cnt_p = pl.pallas_call(
        kernel,
        out_shape=(part_shape,) * 4,
        grid_spec=pltpu.PrefetchScalarGridSpec(
            num_scalar_prefetch=0,
            grid=(_NUM_CORES, tiles_per_core),
            in_specs=[in_spec, in_spec],
            out_specs=(out_spec,) * 4,
        ),
        compiler_params=pltpu.CompilerParams(
            dimension_semantics=("parallel", "arbitrary"),
            vmem_limit_bytes=vmem_limit,
        ),
    )(y2, x2)

    # Tiny wrapper-side finalize: combine the per-core lane/sublane partials
    # (4 x (2,8,128) f32) and form the two scalars.
    pos_sum = jnp.sum(pos_p)
    tot_c = jnp.sum(totc_p)
    tot = jnp.sum(tot_p)
    pos_cnt = jnp.sum(cnt_p)

    if pad:
        # Padded elements are exact zeros (x=0, y=0): each contributes exactly
        # ln(2) to both BCE totals and 0 to the positive stats.
        corr = jnp.float32(pad) * jnp.float32(_LN2)
        tot_c = tot_c - corr
        tot = tot - corr

    n_f = jnp.float32(n)
    neg_cnt = n_f - pos_cnt
    neg_sum = tot_c - pos_sum

    # Masked means; 0 contribution when a class is empty (matches the Python
    # `if len(pos_prob):` / `if len(neg_prob):` guards in the module).
    pos_loss = jnp.where(pos_cnt > 0.0, pos_sum / jnp.maximum(pos_cnt, 1.0), 0.0)
    neg_loss = jnp.where(neg_cnt > 0.0, neg_sum / jnp.maximum(neg_cnt, 1.0), 0.0)

    classify_loss = pos_loss + neg_loss
    classify_loss2 = tot / jnp.maximum(n_f, 1.0)
    return classify_loss, classify_loss2


def _reference(prob, labels, logits):
    # Pure-JAX reference matching the PyTorch module (BCELoss on prob with the
    # -100 log clamp; BCEWithLogitsLoss on logits).
    p = prob.astype(jnp.float32)
    y = labels.astype(jnp.float32)
    x = logits.astype(jnp.float32)
    bce = -(y * jnp.maximum(jnp.log(p), -100.0)
            + (1.0 - y) * jnp.maximum(jnp.log(1.0 - p), -100.0))
    pos = y >= 0.5
    pos_cnt = jnp.sum(pos)
    neg_cnt = jnp.sum(~pos)
    pos_loss = jnp.where(
        pos_cnt > 0,
        jnp.sum(jnp.where(pos, bce, 0.0)) / jnp.maximum(pos_cnt, 1), 0.0)
    neg_loss = jnp.where(
        neg_cnt > 0,
        jnp.sum(jnp.where(pos, 0.0, bce)) / jnp.maximum(neg_cnt, 1), 0.0)
    l2 = jnp.mean(jnp.maximum(x, 0.0) - x * y + jnp.log1p(jnp.exp(-jnp.abs(x))))
    return pos_loss + neg_loss, l2


if __name__ == "__main__":
    key = jax.random.PRNGKey(0)
    k1, k2, k3, k4, k5 = jax.random.split(key, 5)

    # Case 1: small, 128-aligned (no pad pass), single tile, core-1 gets only
    # duplicate (zero-contribution) steps.
    N1 = 1024
    logits1 = jax.random.normal(k1, (N1,), dtype=jnp.float32)
    prob1 = jax.nn.sigmoid(logits1)
    labels1 = (jax.random.uniform(k2, (N1,)) > 0.5).astype(jnp.float32)
    out1 = loss_forward(prob1, labels1, logits1, train=True)
    jax.block_until_ready(out1)
    ref1 = _reference(prob1, labels1, logits1)
    assert jnp.allclose(out1[0], ref1[0], rtol=1e-5, atol=1e-5)
    assert jnp.allclose(out1[1], ref1[1], rtol=1e-5, atol=1e-5)

    # Case 2: unaligned N (exercises the 128-pad + ln(2) correction), int8
    # labels (narrow-dtype streaming), small max_tile_rows to force a
    # multi-tile grid with a ragged last tile split across the 2-core axis.
    N2 = 5000
    logits2 = jax.random.normal(k3, (N2,), dtype=jnp.float32)
    prob2 = jax.nn.sigmoid(logits2)
    labels2 = (jax.random.uniform(k4, (N2,)) > 0.3).astype(jnp.int8)
    out2 = loss_forward(prob2, labels2, logits2, train=True, max_tile_rows=16)
    jax.block_until_ready(out2)
    ref2 = _reference(prob2, labels2, logits2)
    assert jnp.allclose(out2[0], ref2[0], rtol=1e-5, atol=1e-5)
    assert jnp.allclose(out2[1], ref2[1], rtol=1e-5, atol=1e-5)

    # Case 3: all-positive labels (empty negative class -> neg_loss == 0
    # guard), default large tiles.
    N3 = 1024
    logits3 = jax.random.normal(k5, (N3,), dtype=jnp.float32) + 1.0
    prob3 = jax.nn.sigmoid(logits3)
    labels3 = jnp.ones((N3,), dtype=jnp.float32)
    out3 = loss_forward(prob3, labels3, logits3, train=True)
    jax.block_until_ready(out3)
    ref3 = _reference(prob3, labels3, logits3)
    assert jnp.allclose(out3[0], ref3[0], rtol=1e-5, atol=1e-5)
    assert jnp.allclose(out3[1], ref3[1], rtol=1e-5, atol=1e-5)

    print("KERNEL_OK")
</pallas_src>

<mosaic_0001>
module attributes {stable_mosaic.version = 11 : i64} {
  func.func @kernel(%arg0: i32, %arg1: i32, %arg2: memref<8x128xf32, #tpu.memory_space<vmem>>, %arg3: memref<8x128xf32, #tpu.memory_space<vmem>>, %arg4: memref<1x8x128xf32, #tpu.memory_space<vmem>>, %arg5: memref<1x8x128xf32, #tpu.memory_space<vmem>>, %arg6: memref<1x8x128xf32, #tpu.memory_space<vmem>>, %arg7: memref<1x8x128xf32, #tpu.memory_space<vmem>>) attributes {dimension_semantics = [#tpu.dimension_semantics<parallel>, #tpu.dimension_semantics<arbitrary>], iteration_bounds = array<i64: 2, 1>, scalar_prefetch = 0 : i64, scratch_operands = 0 : i64, tpu.core_type = #tpu.core_type<tc>, window_params = [{transform_indices = @transform_0, window_bounds = array<i64: 8, 128>}, {transform_indices = @transform_1, window_bounds = array<i64: 8, 128>}, {transform_indices = @transform_2, window_bounds = array<i64: 1, 8, 128>}, {transform_indices = @transform_3, window_bounds = array<i64: 1, 8, 128>}, {transform_indices = @transform_4, window_bounds = array<i64: 1, 8, 128>}, {transform_indices = @transform_5, window_bounds = array<i64: 1, 8, 128>}]} {
    %c0_i32 = arith.constant 0 : i32
    %0 = arith.cmpi eq, %arg1, %c0_i32 : i32
    %1 = arith.extui %0 : i1 to i32
    %c0_i32_0 = arith.constant 0 : i32
    %2 = arith.cmpi ne, %1, %c0_i32_0 : i32
    scf.if %2 {
      %cst = arith.constant 0.000000e+00 : f32
      %15 = vector.broadcast %cst : f32 to vector<1x8x128xf32>
      %c0_8 = arith.constant 0 : index
      %c0_9 = arith.constant 0 : index
      %c0_10 = arith.constant 0 : index
      %16 = vector.load %arg4[%c0_8, %c0_9, %c0_10] : memref<1x8x128xf32, #tpu.memory_space<vmem>>, vector<1x8x128xf32>
      tpu.vector_store %arg4[%c0_8, %c0_9, %c0_10], %15 {strides = array<i32>} : memref<1x8x128xf32, #tpu.memory_space<vmem>>, vector<1x8x128xf32>,
      %cst_11 = arith.constant 0.000000e+00 : f32
      %17 = vector.broadcast %cst_11 : f32 to vector<1x8x128xf32>
      %c0_12 = arith.constant 0 : index
      %c0_13 = arith.constant 0 : index
      %c0_14 = arith.constant 0 : index
      %18 = vector.load %arg5[%c0_12, %c0_13, %c0_14] : memref<1x8x128xf32, #tpu.memory_space<vmem>>, vector<1x8x128xf32>
      tpu.vector_store %arg5[%c0_12, %c0_13, %c0_14], %17 {strides = array<i32>} : memref<1x8x128xf32, #tpu.memory_space<vmem>>, vector<1x8x128xf32>,
      %cst_15 = arith.constant 0.000000e+00 : f32
      %19 = vector.broadcast %cst_15 : f32 to vector<1x8x128xf32>
      %c0_16 = arith.constant 0 : index
      %c0_17 = arith.constant 0 : index
      %c0_18 = arith.constant 0 : index
      %20 = vector.load %arg6[%c0_16, %c0_17, %c0_18] : memref<1x8x128xf32, #tpu.memory_space<vmem>>, vector<1x8x128xf32>
      tpu.vector_store %arg6[%c0_16, %c0_17, %c0_18], %19 {strides = array<i32>} : memref<1x8x128xf32, #tpu.memory_space<vmem>>, vector<1x8x128xf32>,
      %cst_19 = arith.constant 0.000000e+00 : f32
      %21 = vector.broadcast %cst_19 : f32 to vector<1x8x128xf32>
      %c0_20 = arith.constant 0 : index
      %c0_21 = arith.constant 0 : index
      %c0_22 = arith.constant 0 : index
      %22 = vector.load %arg7[%c0_20, %c0_21, %c0_22] : memref<1x8x128xf32, #tpu.memory_space<vmem>>, vector<1x8x128xf32>
      tpu.vector_store %arg7[%c0_20, %c0_21, %c0_22], %21 {strides = array<i32>} : memref<1x8x128xf32, #tpu.memory_space<vmem>>, vector<1x8x128xf32>,
    } else {
    }
    %c0 = arith.constant 0 : index
    %c0_1 = arith.constant 0 : index
    %3 = vector.load %arg2[%c0, %c0_1] : memref<8x128xf32, #tpu.memory_space<vmem>>, vector<8x128xf32>
    %c0_2 = arith.constant 0 : index
    %c0_3 = arith.constant 0 : index
    %4 = vector.load %arg3[%c0_2, %c0_3] : memref<8x128xf32, #tpu.memory_space<vmem>>, vector<8x128xf32>
    %c1_i32 = arith.constant 1 : i32
    %5 = arith.muli %arg0, %c1_i32 : i32
    %6 = arith.addi %5, %arg1 : i32
    %c8_i32 = arith.constant 8 : i32
    %7 = arith.muli %6, %c8_i32 : i32
    %c8_i32_4 = arith.constant 8 : i32
    %8 = arith.addi %7, %c8_i32_4 : i32
    %c8_i32_5 = arith.constant 8 : i32
    %9 = arith.cmpi sle, %8, %c8_i32_5 : i32
    %10 = arith.extui %9 : i1 to i32
    %c0_i32_6 = arith.constant 0 : i32
    %11 = arith.cmpi ne, %10, %c0_i32_6 : i32
    scf.if %11 {
      %cst = arith.constant 0.000000e+00 : f32
      %15 = vector.broadcast %cst : f32 to vector<8x128xf32>
      %16 = arith.maximumf %4, %15 : vector<8x128xf32>
      %17 = arith.mulf %4, %3 : vector<8x128xf32>
      %18 = arith.subf %16, %17 : vector<8x128xf32>
      %19 = math.absf %4 : vector<8x128xf32>
      %cst_8 = arith.constant 0.000000e+00 : f32
      %20 = vector.broadcast %cst_8 : f32 to vector<8x128xf32>
      %21 = arith.subf %20, %19 : vector<8x128xf32>
      %22 = math.exp %21 : vector<8x128xf32>
      %23 = math.log1p %22 : vector<8x128xf32>
      %24 = arith.addf %18, %23 : vector<8x128xf32>
      %cst_9 = arith.constant 5.000000e-01 : f32
      %25 = vector.broadcast %cst_9 : f32 to vector<8x128xf32>
      %26 = arith.cmpf oge, %3, %25 : vector<8x128xf32>
      %27 = arith.extui %26 : vector<8x128xi1> to vector<8x128xi32>
      %28 = arith.sitofp %27 : vector<8x128xi32> to vector<8x128xf32>
      %cst_10 = arith.constant 1.000000e+02 : f32
      %29 = vector.broadcast %cst_10 : f32 to vector<8x128xf32>
      %30 = arith.minimumf %24, %29 : vector<8x128xf32>
      %c0_11 = arith.constant 0 : index
      %c0_12 = arith.constant 0 : index
      %c0_13 = arith.constant 0 : index
      %31 = vector.load %arg4[%c0_11, %c0_12, %c0_13] : memref<1x8x128xf32, #tpu.memory_space<vmem>>, vector<1x8x128xf32>
      %32 = vector.shape_cast %31 : vector<1x8x128xf32> to vector<8x128xf32>
      %33 = arith.mulf %30, %28 : vector<8x128xf32>
      %34 = vector.shape_cast %33 : vector<8x128xf32> to vector<1x8x128xf32>
      %cst_14 = arith.constant dense<0.000000e+00> : vector<8x128xf32>
      %35 = vector.multi_reduction <add>, %34, %cst_14 [0] : vector<1x8x128xf32> to vector<8x128xf32>
      %36 = arith.addf %32, %35 : vector<8x128xf32>
      %c0_15 = arith.constant 0 : index
      %c0_16 = arith.constant 0 : index
      %c0_17 = arith.constant 0 : index
      %37 = vector.load %arg4[%c0_15, %c0_16, %c0_17] : memref<1x8x128xf32, #tpu.memory_space<vmem>>, vector<1x8x128xf32>
      %38 = vector.shape_cast %37 : vector<1x8x128xf32> to vector<8x128xf32>
      %39 = vector.shape_cast %36 : vector<8x128xf32> to vector<1x8x128xf32>
      tpu.vector_store %arg4[%c0_15, %c0_16, %c0_17], %39 {strides = array<i32>} : memref<1x8x128xf32, #tpu.memory_space<vmem>>, vector<1x8x128xf32>,
      %c0_18 = arith.constant 0 : index
      %c0_19 = arith.constant 0 : index
      %c0_20 = arith.constant 0 : index
      %40 = vector.load %arg5[%c0_18, %c0_19, %c0_20] : memref<1x8x128xf32, #tpu.memory_space<vmem>>, vector<1x8x128xf32>
      %41 = vector.shape_cast %40 : vector<1x8x128xf32> to vector<8x128xf32>
      %42 = vector.shape_cast %30 : vector<8x128xf32> to vector<1x8x128xf32>
      %cst_21 = arith.constant dense<0.000000e+00> : vector<8x128xf32>
      %43 = vector.multi_reduction <add>, %42, %cst_21 [0] : vector<1x8x128xf32> to vector<8x128xf32>
      %44 = arith.addf %41, %43 : vector<8x128xf32>
      %c0_22 = arith.constant 0 : index
      %c0_23 = arith.constant 0 : index
      %c0_24 = arith.constant 0 : index
      %45 = vector.load %arg5[%c0_22, %c0_23, %c0_24] : memref<1x8x128xf32, #tpu.memory_space<vmem>>, vector<1x8x128xf32>
      %46 = vector.shape_cast %45 : vector<1x8x128xf32> to vector<8x128xf32>
      %47 = vector.shape_cast %44 : vector<8x128xf32> to vector<1x8x128xf32>
      tpu.vector_store %arg5[%c0_22, %c0_23, %c0_24], %47 {strides = array<i32>} : memref<1x8x128xf32, #tpu.memory_space<vmem>>, vector<1x8x128xf32>,
      %c0_25 = arith.constant 0 : index
      %c0_26 = arith.constant 0 : index
      %c0_27 = arith.constant 0 : index
      %48 = vector.load %arg6[%c0_25, %c0_26, %c0_27] : memref<1x8x128xf32, #tpu.memory_space<vmem>>, vector<1x8x128xf32>
      %49 = vector.shape_cast %48 : vector<1x8x128xf32> to vector<8x128xf32>
      %50 = vector.shape_cast %24 : vector<8x128xf32> to vector<1x8x128xf32>
      %cst_28 = arith.constant dense<0.000000e+00> : vector<8x128xf32>
      %51 = vector.multi_reduction <add>, %50, %cst_28 [0] : vector<1x8x128xf32> to vector<8x128xf32>
      %52 = arith.addf %49, %51 : vector<8x128xf32>
      %c0_29 = arith.constant 0 : index
      %c0_30 = arith.constant 0 : index
      %c0_31 = arith.constant 0 : index
      %53 = vector.load %arg6[%c0_29, %c0_30, %c0_31] : memref<1x8x128xf32, #tpu.memory_space<vmem>>, vector<1x8x128xf32>
      %54 = vector.shape_cast %53 : vector<1x8x128xf32> to vector<8x128xf32>
      %55 = vector.shape_cast %52 : vector<8x128xf32> to vector<1x8x128xf32>
      tpu.vector_store %arg6[%c0_29, %c0_30, %c0_31], %55 {strides = array<i32>} : memref<1x8x128xf32, #tpu.memory_space<vmem>>, vector<1x8x128xf32>,
      %c0_32 = arith.constant 0 : index
      %c0_33 = arith.constant 0 : index
      %c0_34 = arith.constant 0 : index
      %56 = vector.load %arg7[%c0_32, %c0_33, %c0_34] : memref<1x8x128xf32, #tpu.memory_space<vmem>>, vector<1x8x128xf32>
      %57 = vector.shape_cast %56 : vector<1x8x128xf32> to vector<8x128xf32>
      %58 = vector.shape_cast %28 : vector<8x128xf32> to vector<1x8x128xf32>
      %cst_35 = arith.constant dense<0.000000e+00> : vector<8x128xf32>
      %59 = vector.multi_reduction <add>, %58, %cst_35 [0] : vector<1x8x128xf32> to vector<8x128xf32>
      %60 = arith.addf %57, %59 : vector<8x128xf32>
      %c0_36 = arith.constant 0 : index
      %c0_37 = arith.constant 0 : index
      %c0_38 = arith.constant 0 : index
      %61 = vector.load %arg7[%c0_36, %c0_37, %c0_38] : memref<1x8x128xf32, #tpu.memory_space<vmem>>, vector<1x8x128xf32>
      %62 = vector.shape_cast %61 : vector<1x8x128xf32> to vector<8x128xf32>
      %63 = vector.shape_cast %60 : vector<8x128xf32> to vector<1x8x128xf32>
      tpu.vector_store %arg7[%c0_36, %c0_37, %c0_38], %63 {strides = array<i32>} : memref<1x8x128xf32, #tpu.memory_space<vmem>>, vector<1x8x128xf32>,
    } else {
    }
    %true = arith.constant true
    %12 = arith.xori %9, %true : i1
    %13 = arith.extui %12 : i1 to i32
    %c0_i32_7 = arith.constant 0 : i32
    %14 = arith.cmpi ne, %13, %c0_i32_7 : i32
    scf.if %14 {
      %c8_i32_8 = arith.constant 8 : i32
      %15 = arith.subi %c8_i32_8, %7 : i32
      %c0_i32_9 = arith.constant 0 : i32
      %c8_i32_10 = arith.constant 8 : i32
      %16 = arith.maxsi %c0_i32_9, %15 : i32
      %17 = arith.minsi %c8_i32_10, %16 : i32
      %18 = tpu.iota {dimensions = array<i32: 0>} : vector<8x128xi32>
      %19 = vector.broadcast %17 : i32 to vector<8x128xi32>
      %20 = arith.cmpi slt, %18, %19 : vector<8x128xi32>
      %cst = arith.constant 0.000000e+00 : f32
      %21 = vector.broadcast %cst : f32 to vector<8x128xf32>
      %22 = arith.maximumf %4, %21 : vector<8x128xf32>
      %23 = arith.mulf %4, %3 : vector<8x128xf32>
      %24 = arith.subf %22, %23 : vector<8x128xf32>
      %25 = math.absf %4 : vector<8x128xf32>
      %cst_11 = arith.constant 0.000000e+00 : f32
      %26 = vector.broadcast %cst_11 : f32 to vector<8x128xf32>
      %27 = arith.subf %26, %25 : vector<8x128xf32>
      %28 = math.exp %27 : vector<8x128xf32>
      %29 = math.log1p %28 : vector<8x128xf32>
      %30 = arith.addf %24, %29 : vector<8x128xf32>
      %cst_12 = arith.constant 0.000000e+00 : f32
      %31 = vector.broadcast %cst_12 : f32 to vector<8x128xf32>
      %32 = arith.select %20, %30, %31 : vector<8x128xi1>, vector<8x128xf32>
      %cst_13 = arith.constant 5.000000e-01 : f32
      %33 = vector.broadcast %cst_13 : f32 to vector<8x128xf32>
      %34 = arith.cmpf oge, %3, %33 : vector<8x128xf32>
      %35 = arith.andi %20, %34 : vector<8x128xi1>
      %cst_14 = arith.constant 1.000000e+00 : f32
      %cst_15 = arith.constant 0.000000e+00 : f32
      %36 = vector.broadcast %cst_14 : f32 to vector<8x128xf32>
      %37 = vector.broadcast %cst_15 : f32 to vector<8x128xf32>
      %38 = arith.select %35, %36, %37 : vector<8x128xi1>, vector<8x128xf32>
      %cst_16 = arith.constant 1.000000e+02 : f32
      %39 = vector.broadcast %cst_16 : f32 to vector<8x128xf32>
      %40 = arith.minimumf %32, %39 : vector<8x128xf32>
      %c0_17 = arith.constant 0 : index
      %c0_18 = arith.constant 0 : index
      %c0_19 = arith.constant 0 : index
      %41 = vector.load %arg4[%c0_17, %c0_18, %c0_19] : memref<1x8x128xf32, #tpu.memory_space<vmem>>, vector<1x8x128xf32>
      %42 = vector.shape_cast %41 : vector<1x8x128xf32> to vector<8x128xf32>
      %43 = arith.mulf %40, %38 : vector<8x128xf32>
      %44 = vector.shape_cast %43 : vector<8x128xf32> to vector<1x8x128xf32>
      %cst_20 = arith.constant dense<0.000000e+00> : vector<8x128xf32>
      %45 = vector.multi_reduction <add>, %44, %cst_20 [0] : vector<1x8x128xf32> to vector<8x128xf32>
      %46 = arith.addf %42, %45 : vector<8x128xf32>
      %c0_21 = arith.constant 0 : index
      %c0_22 = arith.constant 0 : index
      %c0_23 = arith.constant 0 : index
      %47 = vector.load %arg4[%c0_21, %c0_22, %c0_23] : memref<1x8x128xf32, #tpu.memory_space<vmem>>, vector<1x8x128xf32>
      %48 = vector.shape_cast %47 : vector<1x8x128xf32> to vector<8x128xf32>
      %49 = vector.shape_cast %46 : vector<8x128xf32> to vector<1x8x128xf32>
      tpu.vector_store %arg4[%c0_21, %c0_22, %c0_23], %49 {strides = array<i32>} : memref<1x8x128xf32, #tpu.memory_space<vmem>>, vector<1x8x128xf32>,
      %c0_24 = arith.constant 0 : index
      %c0_25 = arith.constant 0 : index
      %c0_26 = arith.constant 0 : index
      %50 = vector.load %arg5[%c0_24, %c0_25, %c0_26] : memref<1x8x128xf32, #tpu.memory_space<vmem>>, vector<1x8x128xf32>
      %51 = vector.shape_cast %50 : vector<1x8x128xf32> to vector<8x128xf32>
      %52 = vector.shape_cast %40 : vector<8x128xf32> to vector<1x8x128xf32>
      %cst_27 = arith.constant dense<0.000000e+00> : vector<8x128xf32>
      %53 = vector.multi_reduction <add>, %52, %cst_27 [0] : vector<1x8x128xf32> to vector<8x128xf32>
      %54 = arith.addf %51, %53 : vector<8x128xf32>
      %c0_28 = arith.constant 0 : index
      %c0_29 = arith.constant 0 : index
      %c0_30 = arith.constant 0 : index
      %55 = vector.load %arg5[%c0_28, %c0_29, %c0_30] : memref<1x8x128xf32, #tpu.memory_space<vmem>>, vector<1x8x128xf32>
      %56 = vector.shape_cast %55 : vector<1x8x128xf32> to vector<8x128xf32>
      %57 = vector.shape_cast %54 : vector<8x128xf32> to vector<1x8x128xf32>
      tpu.vector_store %arg5[%c0_28, %c0_29, %c0_30], %57 {strides = array<i32>} : memref<1x8x128xf32, #tpu.memory_space<vmem>>, vector<1x8x128xf32>,
      %c0_31 = arith.constant 0 : index
      %c0_32 = arith.constant 0 : index
      %c0_33 = arith.constant 0 : index
      %58 = vector.load %arg6[%c0_31, %c0_32, %c0_33] : memref<1x8x128xf32, #tpu.memory_space<vmem>>, vector<1x8x128xf32>
      %59 = vector.shape_cast %58 : vector<1x8x128xf32> to vector<8x128xf32>
      %60 = vector.shape_cast %32 : vector<8x128xf32> to vector<1x8x128xf32>
      %cst_34 = arith.constant dense<0.000000e+00> : vector<8x128xf32>
      %61 = vector.multi_reduction <add>, %60, %cst_34 [0] : vector<1x8x128xf32> to vector<8x128xf32>
      %62 = arith.addf %59, %61 : vector<8x128xf32>
      %c0_35 = arith.constant 0 : index
      %c0_36 = arith.constant 0 : index
      %c0_37 = arith.constant 0 : index
      %63 = vector.load %arg6[%c0_35, %c0_36, %c0_37] : memref<1x8x128xf32, #tpu.memory_space<vmem>>, vector<1x8x128xf32>
      %64 = vector.shape_cast %63 : vector<1x8x128xf32> to vector<8x128xf32>
      %65 = vector.shape_cast %62 : vector<8x128xf32> to vector<1x8x128xf32>
      tpu.vector_store %arg6[%c0_35, %c0_36, %c0_37], %65 {strides = array<i32>} : memref<1x8x128xf32, #tpu.memory_space<vmem>>, vector<1x8x128xf32>,
      %c0_38 = arith.constant 0 : index
      %c0_39 = arith.constant 0 : index
      %c0_40 = arith.constant 0 : index
      %66 = vector.load %arg7[%c0_38, %c0_39, %c0_40] : memref<1x8x128xf32, #tpu.memory_space<vmem>>, vector<1x8x128xf32>
      %67 = vector.shape_cast %66 : vector<1x8x128xf32> to vector<8x128xf32>
      %68 = vector.shape_cast %38 : vector<8x128xf32> to vector<1x8x128xf32>
      %cst_41 = arith.constant dense<0.000000e+00> : vector<8x128xf32>
      %69 = vector.multi_reduction <add>, %68, %cst_41 [0] : vector<1x8x128xf32> to vector<8x128xf32>
      %70 = arith.addf %67, %69 : vector<8x128xf32>
      %c0_42 = arith.constant 0 : index
      %c0_43 = arith.constant 0 : index
      %c0_44 = arith.constant 0 : index
      %71 = vector.load %arg7[%c0_42, %c0_43, %c0_44] : memref<1x8x128xf32, #tpu.memory_space<vmem>>, vector<1x8x128xf32>
      %72 = vector.shape_cast %71 : vector<1x8x128xf32> to vector<8x128xf32>
      %73 = vector.shape_cast %70 : vector<8x128xf32> to vector<1x8x128xf32>
      tpu.vector_store %arg7[%c0_42, %c0_43, %c0_44], %73 {strides = array<i32>} : memref<1x8x128xf32, #tpu.memory_space<vmem>>, vector<1x8x128xf32>,
    } else {
    }
    return
  }
  func.func @transform_0(%arg0: i32, %arg1: i32) -> (i32, i32) {
    %c1_i32 = arith.constant 1 : i32
    %0 = arith.muli %arg0, %c1_i32 : i32
    %1 = arith.addi %0, %arg1 : i32
    %c0_i32 = arith.constant 0 : i32
    %2 = arith.minsi %1, %c0_i32 : i32
    %c0_i32_0 = arith.constant 0 : i32
    %c0_i32_1 = arith.constant 0 : i32
    return %2, %c0_i32_0 : i32, i32
  }
  func.func @transform_1(%arg0: i32, %arg1: i32) -> (i32, i32) {
    %c1_i32 = arith.constant 1 : i32
    %0 = arith.muli %arg0, %c1_i32 : i32
    %1 = arith.addi %0, %arg1 : i32
    %c0_i32 = arith.constant 0 : i32
    %2 = arith.minsi %1, %c0_i32 : i32
    %c0_i32_0 = arith.constant 0 : i32
    %c0_i32_1 = arith.constant 0 : i32
    return %2, %c0_i32_0 : i32, i32
  }
  func.func @transform_2(%arg0: i32, %arg1: i32) -> (i32, i32, i32) {
    %c0_i32 = arith.constant 0 : i32
    %c0_i32_0 = arith.constant 0 : i32
    %c0_i32_1 = arith.constant 0 : i32
    return %arg0, %c0_i32, %c0_i32_0 : i32, i32, i32
  }
  func.func @transform_3(%arg0: i32, %arg1: i32) -> (i32, i32, i32) {
    %c0_i32 = arith.constant 0 : i32
    %c0_i32_0 = arith.constant 0 : i32
    %c0_i32_1 = arith.constant 0 : i32
    return %arg0, %c0_i32, %c0_i32_0 : i32, i32, i32
  }
  func.func @transform_4(%arg0: i32, %arg1: i32) -> (i32, i32, i32) {
    %c0_i32 = arith.constant 0 : i32
    %c0_i32_0 = arith.constant 0 : i32
    %c0_i32_1 = arith.constant 0 : i32
    return %arg0, %c0_i32, %c0_i32_0 : i32, i32, i32
  }
  func.func @transform_5(%arg0: i32, %arg1: i32) -> (i32, i32, i32) {
    %c0_i32 = arith.constant 0 : i32
    %c0_i32_0 = arith.constant 0 : i32
    %c0_i32_1 = arith.constant 0 : i32
    return %arg0, %c0_i32, %c0_i32_0 : i32, i32, i32
  }
}

</mosaic_0001>

<bundles_post_ra>
// kernel: tpu_custom_call.1
= control target key start
LH: loop header
LB: loop body
LE: loop exit
PB: predicated region body
PF: predicated region fallthrough
CT: control target
= control target key end

     0   :  { %s1525_s0 = inlined_call_operand.hbm [shape: f32[8,128], index: 0, kind: input, shape index: {}]   ;;  %s1526_s1 = inlined_call_operand.hbm [shape: f32[8,128], index: 1, kind: input, shape index: {}]   ;;  %s1527_s2 = inlined_call_operand.hbm [shape: f32[2,8,128], index: 2, kind: output, shape index: {0}]   ;;  %s1528_s3 = inlined_call_operand.hbm [shape: f32[2,8,128], index: 3, kind: output, shape index: {1}]   ;;  %s1529_s4 = inlined_call_operand.hbm [shape: f32[2,8,128], index: 4, kind: output, shape index: {2}]   ;;  %s1530_s5 = inlined_call_operand.hbm [shape: f32[2,8,128], index: 5, kind: output, shape index: {3}]  }
   0x1   :  { %1534 = sst [smem:[#allocation18_spill]] %s1525_s0 }
   0x2   :  { %1535 = sst [smem:[#allocation19_spill]] %s1526_s1 }
   0x3   :  { %11 = vsyncpa [#allocation3], 0 }
   0x4   :  { %13 = vsyncpa [#allocation3 + $0x1], 0 }
   0x5   :  { %14 = vsyncpa [#allocation6], 0 }
   0x6   :  { %16 = vsyncpa [#allocation6 + $0x1], 0 }
   0x7   :  { %17 = vsyncpa [#allocation4], 0 }
   0x8   :  { %19 = vsyncpa [#allocation4 + $0x1], 0 }
   0x9   :  { %20 = vsyncpa [#allocation9], 0 }
   0xa   :  { %22 = vsyncpa [#allocation9 + $0x1], 0 }
   0xb   :  { %23 = vsyncpa [#allocation12], 0 }
   0xc   :  { %25 = vsyncpa [#allocation12 + $0x1], 0  ;;  %s1163_s18 = smov 0   ;;  %s1165_s19 = smov 0  }
   0xd   :  { %s1167_s20 = smov 0   ;;  %s1169_s21 = smov 0  }
   0xe   :  { %s1171_s22 = smov 0   ;;  %s1173_s23 = smov 0  }
   0xf   :  { %s1175_s24 = smov 0   ;;  %s1177_s25 = smov 0  }
  0x10 LB: > { %s1202_s26 = sadd.s32 4294967295, %s1122_s25   ;;  %s1533_s27 = sadd.s32 4294967294, %s1122_s25   ;;  %s1122_s25 = sphi %s1177_s25, %s31_s25   ;;  %s1118_s24 = sphi %s1175_s24, %s1560_s24   ;;  %s1114_s23 = sphi %s1173_s23, %s1559_s23   ;;  %s1110_s22 = sphi %s1171_s22, %s1515_s22   ;;  %s1106_s21 = sphi %s1169_s21, %s1558_s21   ;;  %s1102_s20 = sphi %s1167_s20, %s1557_s20   ;;  %s1098_s19 = sphi %s1165_s19, %s1556_s19   ;;  %s1094_s18 = sphi %s1163_s18, %s1555_s18  }
  0x11   : > { %s43_s28 = sadd.s32 1, %s1118_s24  ;;  %p1091_p1 = scmp.ne.s32.totalorder %s1110_s22, 0 }
  0x12   : > { %p45_p0 = scmp.ge.s32.totalorder %s43_s28, 2  ;;  %p64_p2 = scmp.eq.s32.totalorder %s1122_s25, 0 }
  0x13   : > { %p69_p3 = scmp.ne.s32.totalorder %s1110_s22, %s1106_s21  ;;  %p70_p5 = scmp.eq.s32.totalorder %s1202_s26, 0 }
  0x14   : > { %s1562_s28 = smov (%p45_p0, %s43_s28), 0  ;;  %p1211_p4 = por %p1091_p1, %p64_p2 }
  0x15   : > { %p1216_p6 = por %p70_p5, %p69_p3  ;;  %s111_s6 = ssub.s32 %s1118_s24, %s1562_s28 }
  0x16   : > { %p112_p7 = scmp.eq.s32.totalorder %s111_s6, 0  ;;  %s114_s7 = sadd.s32 1, %s1102_s20 }
  0x17   : > { %s1537_s30 = scalar_select %p1216_p6, 1, 0 }
  0x18   : > { %s1224_s8 = scalar_select %p112_p7, %s1102_s20, %s114_s7  }
  0x19   : > { %p124_p8 = scmp.ne.s32.totalorder %s1102_s20, %s1098_s19  ;;  %p125_p9 = scmp.eq.s32.totalorder %s1202_s26, 1 }
  0x1a   : > { %p130_p10 = scmp.ne.s32.totalorder %s1098_s19, %s1094_s18  ;;  %p131_p11 = scmp.eq.s32.totalorder %s1533_s27, 1 }
  0x1b   : > { %p1233_p12 = por %p125_p9, %p124_p8  ;;  %p778_p1 = scmp.lt.s32.totalorder %s1122_s25, 2 }
  0x1c   : > { %p1238_p0 = por %p131_p11, %p130_p10  ;;  %s1124_s11 = smov [#allocation2]  }
  0x1d   : > { %s1538_s9 = scalar_select %p1233_p12, 1, 0 }
  0x1e   : > { %s1539_s10 = scalar_select %p1238_p0, 1, 0 }
  0x1f   : > { %s243_s12 = sshll.u32 %s1124_s11, 4  ;;  %p1245_p2 = pnand %p778_p1, %p1211_p4  ;;  %s244_s12 = int_to_ptr.vmem [resolvable:$true] %s243_s12 }
  0x20   : > { %s1541_s0 = sld [smem:[#allocation18_spill]] }
  0x21   : > { %p865_p8 = pneg %p1245_p2 }
  0x26   : > { %s863_s16 = scalar_lea.hbm %s1541_s0, 128 }
  0x27   : > { %p864_p7 = scmp.ne.s32.totalorder %s1541_s0, %s863_s16  ;;  %p870_p10 = scmp.lt.u32.totalorder %s863_s16, %s863_s16 }
  0x28   : > { %p872_p11 = scmp.lt.u32.totalorder %s863_s16, %s1541_s0 }
  0x29   : > { %p866_p4 = pnand %p865_p8, %p864_p7 }
  0x2a   : > { %p873_p1 = por %p872_p11, %p870_p10 }
  0x2b   : > { %p867_p9 = pneg %p866_p4 }
  0x2d   : > { %p874_p13 = pnand %p873_p1, %p867_p9 }
  0x2f   : > { %877 = shalt.err (!%p874_p13)
}
  0x30   : > { %s878_s7 = scalar_lea.vmem %s244_s12, 128  ;;  %s885_s11 = scalar_lea.vmem %s244_s12, 256 }
  0x31   : > { %p879_p3 = scmp.ne.s32.totalorder %s244_s12, %s878_s7  ;;  %p886_p12 = scmp.lt.s32.totalorder %s244_s12, %s244_s12 }
  0x32   : > { %p887_p6 = scmp.lt.s32.totalorder %s885_s11, %s878_s7 }
  0x33   : > { %p881_p5 = pnand %p879_p3, %p865_p8 }
  0x34   : > { %p888_p7 = por %p887_p6, %p886_p12 }
  0x35   : > { %p882_p0 = pneg %p881_p5 }
  0x37   : > { %p889_p4 = pnand %p888_p7, %p882_p0 }
  0x39   : > { %892 = shalt.err (!%p889_p4)
}
  0x3a   : > { %761 = dma.hbm_to_vmem [thread:$0]  (!%p1245_p2), %s1541_s0, 128, %s244_s12, [#allocation3]  }
  0x3b   : > { %p1542_p13 = scmp.lt.s32.totalorder %s1122_s25, 3  ;;  %p1543_p9 = scmp.ge.s32.totalorder %s1122_s25, 1 }
  0x3c   : > { %s1125_s17 = smov [#allocation5]   ;;  %s1545_s1 = sld [smem:[#allocation19_spill]] }
  0x3d   : > { %p1277_p10 = pnand %p1543_p9, %p1542_p13  ;;  %s264_s21 = sshll.u32 %s1125_s17, 4  ;;  %s265_s21 = int_to_ptr.vmem [resolvable:$true] %s264_s21 }
  0x3f   : > { %s1544_s16 = scalar_select %p1277_p10, 1, 0 }
  0x42   : > { %s893_s7 = scalar_lea.hbm %s1545_s1, 128 }
  0x43   : > { %p894_p6 = scmp.ne.s32.totalorder %s1545_s1, %s893_s7  ;;  %p900_p3 = scmp.lt.u32.totalorder %s893_s7, %s893_s7 }
  0x44   : > { %p902_p5 = scmp.lt.u32.totalorder %s893_s7, %s1545_s1 }
  0x45   : > { %p896_p12 = pnand %p894_p6, %p865_p8 }
  0x46   : > { %p903_p11 = por %p902_p5, %p900_p3 }
  0x47   : > { %p897_p0 = pneg %p896_p12 }
  0x49   : > { %p904_p1 = pnand %p903_p11, %p897_p0 }
  0x4b   : > { %907 = shalt.err (!%p904_p1)
}
  0x4c   : > { %s908_s15 = scalar_lea.vmem %s265_s21, 128  ;;  %s915_s27 = scalar_lea.vmem %s265_s21, 256 }
  0x4d   : > { %p909_p7 = scmp.ne.s32.totalorder %s265_s21, %s908_s15  ;;  %p916_p9 = scmp.lt.s32.totalorder %s265_s21, %s265_s21 }
  0x4e   : > { %p917_p10 = scmp.lt.s32.totalorder %s915_s27, %s908_s15 }
  0x4f   : > { %p911_p4 = pnand %p909_p7, %p865_p8 }
  0x50   : > { %p918_p6 = por %p917_p10, %p916_p9 }
  0x51   : > { %p912_p13 = pneg %p911_p4 }
  0x53   : > { %p919_p12 = pnand %p918_p6, %p912_p13 }
  0x55   : > { %922 = shalt.err (!%p919_p12)
}
  0x56   : > { %764 = dma.hbm_to_vmem [thread:$0]  (!%p1245_p2), %s1545_s1, 128, %s265_s21, [#allocation6]  }
  0x57   : > { %p1546_p0 = scmp.ne.s32.totalorder %s1544_s16, 0 }
  0x58   : > { %s275_s6 = sand.u32 (!%p1546_p0), 1, %s1110_s22   ;;  %p1547_p8 = scmp.ne.s32.totalorder (!%p1546_p0), %s1537_s30, 0 }
  0x59   : > { %273 = sbr.rel (%p1546_p0) target bundleno = 287 (0x11f), region = 28  ;;  %s719_s7 = sshll.u32 (!%p1546_p0), %s275_s6, 3 }
  0x5a   : > { %s276_s11 = scalar_lea.sflag (!%p1546_p0), [#allocation3], %s275_s6  ;;  %s279_s12 = scalar_lea.vmem (!%p1546_p0), [#allocation2], %s719_s7 }
  0x60   : > { %1072 = dma.done.wait (%p1547_p8), %s276_s11, 128  }
  0x61   : > { %1074 = vsyncadd (%p1547_p8), %s276_s11, 4294967168  ;;  %s285_s13 = scalar_lea.sflag [#allocation6], %s275_s6  ;;  %s288_s14 = scalar_lea.vmem [#allocation5], %s719_s7 }
  0x62   : > { %1076 = dma.done.wait (%p1547_p8), %s285_s13, 128  }
  0x63   : > { %1078 = vsyncadd (%p1547_p8), %s285_s13, 4294967168  ;;  %s1313_s16 = sand.u32 1, %s1098_s19   ;;  %s725_s21 = sshll.u32 %s1114_s23, 3  ;;  %v1126_v0 = vmov 0.0   ;;  %v1333_v1 = vld [vmem:[%s279_s12] sm:$0xff]  ;;  %v1335_v2 = vld [vmem:[%s288_s14] sm:$0xff] }
  0x64   : > { %s721_s15 = sshll.u32 %s1313_s16, 3  ;;  %s1319_s27 = sadd.s32 8, %s725_s21 }
  0x65   : > { %s1321_s17 = scalar_lea.vmem [#allocation7], %s721_s15  ;;  %s1324_s29 = scalar_lea.vmem [#allocation8], %s721_s15 }
  0x66   : > { %345 = vst [vmem:[%s1321_s17] sm:$0xff] %v1126_v0  ;;  %346 = vst [vmem:[%s1324_s29] sm:$0xff] %v1126_v0  ;;  %s1327_s30 = scalar_lea.vmem [#allocation10], %s721_s15  ;;  %s1330_s6 = scalar_lea.vmem [#allocation11], %s721_s15 }
  0x67   : > { %347 = vst [vmem:[%s1327_s30] sm:$0xff] %v1126_v0  ;;  %348 = vst [vmem:[%s1330_s6] sm:$0xff] %v1126_v0  ;;  %p726_p2 = scmp.gt.s32.totalorder %s1319_s27, 8 }
  0x68   : > { %v361_v3 = vand.u32 (!%p726_p2), 2147483647, %v1335_v2  ;;  %vm375_vm0 = vcmp.ge.f32.partialorder (!%p726_p2), %v1333_v1, 0.5  ;;  %v1127_v6 = vmov (!%p726_p2), 0.0   ;;  %v358_v14 = vmax.f32 (!%p726_p2), %v1335_v2, 0.0 }
  0x69   : > { %357 = sbr.rel (%p726_p2) target bundleno = 146 (0x92), region = 44  ;;  %v727_v7 = vsel (!%p726_p2), %vm375_vm0, 1.0, %v1127_v6  ;;  %v359_v15 = vmul.f32 (!%p726_p2), %v1335_v2, %v1333_v1 }
  0x6a   : > { %v362_v5 = vsub.f32 (!%p726_p2), 0.0, %v361_v3 }
  0x6b   : > { %v360_v19 = vsub.f32 (!%p726_p2), %v358_v14, %v359_v15 }
  0x6c   : > { %v363_v9 = vmul.f32 (!%p726_p2), 1.442695, %v362_v5 }
  0x6d   : > { %v384_v24 = vld [vmem:[%s1324_s29] sm:$0xff] (!%p726_p2)  ;;  %v379_v27 = vld [vmem:[%s1321_s17] sm:$0xff] (!%p726_p2) }
  0x6e   : > { %v392_v4 = vld [vmem:[%s1330_s6] sm:$0xff] (!%p726_p2)  ;;  %855 = vpow2.f32 (!%p726_p2), %v363_v9  ;;  %v388_v22 = vld [vmem:[%s1327_s30] sm:$0xff] (!%p726_p2) }
  0x6f   : > { %v394_v8 = vadd.f32 (!%p726_p2), %v727_v7, %v392_v4 }
  0x71   : > { %395 = vst [vmem:[%s1330_s6] sm:$0xff] %v394_v8 }
  0x78   : > { %v856_v10 = vpop.eup %855 }
  0x79   : > { %v365_v11 = vadd.f32 1.0, %v856_v10  ;;  %v368_v12 = vmul.f32 -0.5, %v856_v10  ;;  %v371_v16 = vand.u32 2147483647, %v856_v10 }
  0x7b   : > { %857 = vlog2.f32 %v365_v11  ;;  %v369_v13 = vadd.f32 1.0, %v368_v12  ;;  %vm372_vm1 = vcmp.lt.f32.partialorder %v371_v16, 0.0004427343 }
  0x7d   : > { %v370_v17 = vmul.f32 %v856_v10, %v369_v13 }
  0x85   : > { %v858_v18 = vpop.eup %857 }
  0x86   : > { %v367_v20 = vmul.f32 0.6931472, %v858_v18 }
  0x88   : > { %v373_v21 = vsel %vm372_vm1, %v370_v17, %v367_v20 }
  0x89   : > { %v374_v23 = vadd.f32 %v373_v21, %v360_v19 }
  0x8b   : > { %v378_v25 = vmin.f32 %v374_v23, 100.0  ;;  %v390_v26 = vadd.f32 %v388_v22, %v374_v23 }
  0x8d   : > { %v380_v28 = vmul.f32 %v727_v7, %v378_v25  ;;  %v386_v29 = vadd.f32 %v384_v24, %v378_v25  ;;  %391 = vst [vmem:[%s1327_s30] sm:$0xff] %v390_v26 }
  0x8f   : > { %v382_v30 = vadd.f32 %v380_v28, %v379_v27  ;;  %387 = vst [vmem:[%s1324_s29] sm:$0xff] %v386_v29 }
  0x91   : > { %383 = vst [vmem:[%s1321_s17] sm:$0xff] %v382_v30 }
  0x92 PF: > { %p728_p10 = scmp.le.s32.totalorder %s1319_s27, 8 }
  0x93   : > { %s400_s7 = ssub.s32 (!%p728_p10), 8, %s725_s21  ;;  %v405_v31 = vlaneseq (!%p728_p10)  ;;  %v412_v32 = vand.u32 (!%p728_p10), 2147483647, %v1335_v2  ;;  %vm427_vm2 = vcmp.ge.f32.partialorder (!%p728_p10), %v1333_v1, 0.5  ;;  %v444_v38 = vld [vmem:[%s1330_s6] sm:$0xff] (!%p728_p10)  ;;  %v1128_v39 = vmov (!%p728_p10), 0.0  }
  0x94   : > { %399 = sbr.rel (%p728_p10) target bundleno = 190 (0xbe), region = 48  ;;  %p401_p3 = scmp.gt.s32.totalorder (!%p728_p10), %s400_s7, 0  ;;  %v409_v46 = vmax.f32 (!%p728_p10), %v1335_v2, 0.0  ;;  %v410_v47 = vmul.f32 (!%p728_p10), %v1335_v2, %v1333_v1  ;;  %v440_v55 = vld [vmem:[%s1327_s30] sm:$0xff] (!%p728_p10) }
  0x95   : > { %p729_p5 = scmp.lt.s32.totalorder (!%p728_p10), %s400_s7, 8  ;;  %v413_v33 = vsub.f32 (!%p728_p10), 0.0, %v412_v32  ;;  %v406_v34 = vshrl.u32 (!%p728_p10), %v405_v31, 7 }
  0x96   : > { %v411_v51 = vsub.f32 (!%p728_p10), %v409_v46, %v410_v47  ;;  %v436_v57 = vld [vmem:[%s1324_s29] sm:$0xff] (!%p728_p10) }
  0x97   : > { %v414_v35 = vmul.f32 (!%p728_p10), 1.442695, %v413_v33 }
  0x98   : > { %v431_v60 = vld [vmem:[%s1321_s17] sm:$0xff] (!%p728_p10) }
  0x99   : > { %859 = vpow2.f32 (!%p728_p10), %v414_v35 }
  0x9b   : > { %s1564_s7 = smov (!%p401_p3, %s400_s7), 0 }
  0x9c   : > { %s1566_s7 = smov (!%p729_p5, %s1564_s7), 8 }
  0x9d   : > { %v407_v36 = vstv %s1566_s7 }
  0x9e   : > { %vm1356_vm3 = vcmp.lt.s32.totalorder %v406_v34, %v407_v36 }
  0x9f   : > { %vm428_vm4 = vmand %vm1356_vm3, %vm427_vm2 }
  0xa0   : > { %v429_v40 = vsel %vm428_vm4, 1.0, %v1128_v39 }
  0xa1   : > { %v446_v41 = vadd.f32 %v444_v38, %v429_v40 }
  0xa3   : > { %447 = vst [vmem:[%s1330_s6] sm:$0xff] %v446_v41  ;;  %v860_v42 = vpop.eup %859 }
  0xa4   : > { %v416_v43 = vadd.f32 1.0, %v860_v42  ;;  %v419_v44 = vmul.f32 -0.5, %v860_v42  ;;  %v422_v48 = vand.u32 2147483647, %v860_v42 }
  0xa6   : > { %861 = vlog2.f32 %v416_v43  ;;  %v420_v45 = vadd.f32 1.0, %v419_v44  ;;  %vm423_vm5 = vcmp.lt.f32.partialorder %v422_v48, 0.0004427343 }
  0xa8   : > { %v421_v49 = vmul.f32 %v860_v42, %v420_v45 }
  0xb0   : > { %v862_v50 = vpop.eup %861 }
  0xb1   : > { %v418_v52 = vmul.f32 0.6931472, %v862_v50 }
  0xb3   : > { %v424_v53 = vsel %vm423_vm5, %v421_v49, %v418_v52 }
  0xb4   : > { %v425_v54 = vadd.f32 %v424_v53, %v411_v51 }
  0xb6   : > { %v426_v56 = vsel %vm1356_vm3, %v425_v54, 0.0 }
  0xb7   : > { %v430_v58 = vmin.f32 %v426_v56, 100.0  ;;  %v442_v59 = vadd.f32 %v440_v55, %v426_v56 }
  0xb9   : > { %v432_v61 = vmul.f32 %v430_v58, %v429_v40  ;;  %v438_v62 = vadd.f32 %v436_v57, %v430_v58  ;;  %443 = vst [vmem:[%s1327_s30] sm:$0xff] %v442_v59 }
  0xbb   : > { %v434_v63 = vadd.f32 %v432_v61, %v431_v60  ;;  %439 = vst [vmem:[%s1324_s29] sm:$0xff] %v438_v62 }
  0xbd   : > { %435 = vst [vmem:[%s1321_s17] sm:$0xff] %v434_v63 }
  0xbe PF: > { %s453_s11 = sand.u32 1, %s1202_s26   ;;  %s1377_s12 = sshll.u32 %s1114_s23, 7 }
  0xbf   : > { %s1383_s21 = scalar_lea.hbm %s1528_s3, %s1377_s12  ;;  %s490_s15 = sshll.u32 %s1324_s29, 4  ;;  %s1386_s15 = int_to_ptr.vmem [resolvable:$true] %s490_s15 }
  0xc0   : > { %s1392_s0 = scalar_lea.hbm %s1527_s2, %s1377_s12  ;;  %s1394_s23 = scalar_lea.sflag [#allocation9], %s453_s11 }
  0xc1   : > { %s923_s26 = scalar_lea.vmem %s1386_s15, 128  ;;  %p1550_p1 = scmp.ne.s32.totalorder %s1538_s9, 0 }
  0xc2   : > { %p924_p11 = scmp.ne.s32.totalorder %s1386_s15, %s923_s26  ;;  %s1129_s13 = smov [#allocation8]  }
  0xc3   : > { %s927_s14 = sshll.u32 %s1129_s13, 4  ;;  %s928_s14 = int_to_ptr.vmem [resolvable:$false] %s927_s14 }
  0xc4   : > { %p925_p7 = pnand %p924_p11, %p1550_p1  ;;  %s929_s29 = scalar_lea.vmem %s928_s14, 256 }
  0xc5   : > { %p930_p13 = scmp.lt.s32.totalorder %s1386_s15, %s928_s14  ;;  %p931_p9 = scmp.lt.s32.totalorder %s929_s29, %s923_s26 }
  0xc6   : > { %p926_p4 = pneg %p925_p7 }
  0xc7   : > { %p932_p6 = por %p931_p9, %p930_p13 }
  0xc9   : > { %p933_p12 = pnand %p932_p6, %p926_p4 }
  0xcb   : > { %936 = shalt.err (!%p933_p12)
}
  0xcc   : > { %s937_s11 = scalar_lea.hbm %s1383_s21, 128  ;;  %s941_s13 = scalar_lea.hbm %s1528_s3, 256 }
  0xcd   : > { %p938_p0 = scmp.ne.s32.totalorder %s1383_s21, %s937_s11  ;;  %p942_p10 = scmp.lt.u32.totalorder %s1383_s21, %s1528_s3 }
  0xce   : > { %p943_p3 = scmp.lt.u32.totalorder %s941_s13, %s937_s11  ;;  %p945_p11 = scmp.lt.u32.totalorder %s937_s11, %s1383_s21 }
  0xcf   : > { %p939_p8 = pnand %p938_p0, %p1550_p1 }
  0xd0   : > { %p944_p5 = por %p943_p3, %p942_p10 }
  0xd1   : > { %p940_p2 = pneg %p939_p8 }
  0xd2   : > { %p946_p7 = por %p945_p11, %p944_p5 }
  0xd4   : > { %p947_p4 = pnand %p946_p7, %p940_p2 }
  0xd6   : > { %950 = shalt.err (!%p947_p4)
}
  0xd7   : > { %751 = dma.vmem_to_hbm [thread:$0]  (%p1550_p1), %s1386_s15, 128, %s1383_s21, %s1394_s23  }
  0xd8   : > { %s477_s26 = sshll.u32 %s1321_s17, 4  ;;  %s1423_s27 = scalar_lea.hbm %s1529_s4, %s1377_s12  ;;  %s1425_s26 = int_to_ptr.vmem [resolvable:$true] %s477_s26 }
  0xd9   : > { %s449_s7 = scalar_lea.sflag [#allocation4], %s1313_s16  ;;  %s951_s13 = scalar_lea.vmem %s1425_s26, 128 }
  0xda   : > { %p952_p13 = scmp.ne.s32.totalorder %s1425_s26, %s951_s13  ;;  %s1130_s14 = smov [#allocation7]  }
  0xdb   : > { %s955_s21 = sshll.u32 %s1130_s14, 4  ;;  %s956_s21 = int_to_ptr.vmem [resolvable:$false] %s955_s21 }
  0xdc   : > { %p953_p9 = pnand %p952_p13, %p1550_p1  ;;  %s957_s17 = scalar_lea.vmem %s956_s21, 256 }
  0xdd   : > { %p958_p12 = scmp.lt.s32.totalorder %s1425_s26, %s956_s21  ;;  %p959_p0 = scmp.lt.s32.totalorder %s957_s17, %s951_s13 }
  0xde   : > { %p954_p6 = pneg %p953_p9 }
  0xdf   : > { %p960_p8 = por %p959_p0, %p958_p12 }
  0xe1   : > { %p961_p2 = pnand %p960_p8, %p954_p6 }
  0xe3   : > { %964 = shalt.err (!%p961_p2)
}
  0xe4   : > { %s965_s15 = scalar_lea.hbm %s1392_s0, 128  ;;  %s969_s14 = scalar_lea.hbm %s1527_s2, 256 }
  0xe5   : > { %p966_p10 = scmp.ne.s32.totalorder %s1392_s0, %s965_s15  ;;  %p970_p11 = scmp.lt.u32.totalorder %s1392_s0, %s1527_s2 }
  0xe6   : > { %p971_p7 = scmp.lt.u32.totalorder %s969_s14, %s965_s15  ;;  %p973_p13 = scmp.lt.u32.totalorder %s965_s15, %s1392_s0 }
  0xe7   : > { %p967_p3 = pnand %p966_p10, %p1550_p1 }
  0xe8   : > { %p972_p4 = por %p971_p7, %p970_p11 }
  0xe9   : > { %p968_p5 = pneg %p967_p3 }
  0xea   : > { %p974_p9 = por %p973_p13, %p972_p4 }
  0xec   : > { %p975_p6 = pnand %p974_p9, %p968_p5 }
  0xee   : > { %978 = shalt.err (!%p975_p6)
}
  0xef   : > { %750 = dma.vmem_to_hbm [thread:$0]  (%p1550_p1), %s1425_s26, 128, %s1392_s0, %s449_s7  }
  0xf0   : > { %s1551_s13 = sshll.u32 %s1327_s30, 4  ;;  %s1131_s11 = smov [#allocation10]   ;;  %s504_s13 = int_to_ptr.vmem [resolvable:$true] %s1551_s13 }
  0xf1   : > { %s979_s17 = scalar_lea.vmem %s504_s13, 128  ;;  %s983_s1 = sshll.u32 %s1131_s11, 4  ;;  %s984_s1 = int_to_ptr.vmem [resolvable:$false] %s983_s1 }
  0xf2   : > { %p980_p12 = scmp.ne.s32.totalorder %s504_s13, %s979_s17  ;;  %s985_s15 = scalar_lea.vmem %s984_s1, 256 }
  0xf3   : > { %p986_p2 = scmp.lt.s32.totalorder %s504_s13, %s984_s1  ;;  %p987_p10 = scmp.lt.s32.totalorder %s985_s15, %s979_s17 }
  0xf4   : > { %p981_p0 = pnand %p980_p12, %p1550_p1 }
  0xf5   : > { %p988_p3 = por %p987_p10, %p986_p2 }
  0xf6   : > { %p982_p8 = pneg %p981_p0 }
  0xf8   : > { %p989_p5 = pnand %p988_p3, %p982_p8 }
  0xfa   : > { %992 = shalt.err (!%p989_p5)
}
  0xfb   : > { %s993_s0 = scalar_lea.hbm %s1423_s27, 128  ;;  %s997_s7 = scalar_lea.hbm %s1529_s4, 256 }
  0xfc   : > { %p994_p11 = scmp.ne.s32.totalorder %s1423_s27, %s993_s0  ;;  %p998_p13 = scmp.lt.u32.totalorder %s1423_s27, %s1529_s4 }
  0xfd   : > { %p999_p9 = scmp.lt.u32.totalorder %s997_s7, %s993_s0  ;;  %p1001_p12 = scmp.lt.u32.totalorder %s993_s0, %s1423_s27 }
  0xfe   : > { %p995_p7 = pnand %p994_p11, %p1550_p1 }
  0xff   : > { %p1000_p6 = por %p999_p9, %p998_p13 }
 0x100   : > { %p996_p4 = pneg %p995_p7 }
 0x101   : > { %p1002_p0 = por %p1001_p12, %p1000_p6 }
 0x103   : > { %p1003_p8 = pnand %p1002_p0, %p996_p4 }
 0x105   : > { %1006 = shalt.err (!%p1003_p8)
}
 0x106   : > { %752 = dma.vmem_to_hbm [thread:$0]  (%p1550_p1), %s504_s13, 128, %s1423_s27, %s1394_s23  }
 0x107   : > { %s1474_s11 = scalar_lea.hbm %s1530_s5, %s1377_s12  ;;  %s516_s1 = sshll.u32 %s1330_s6, 4  ;;  %s517_s1 = int_to_ptr.vmem [resolvable:$true] %s516_s1 }
 0x108   : > { %s464_s15 = scalar_lea.sflag [#allocation12], %s1313_s16  ;;  %s1007_s0 = scalar_lea.vmem %s517_s1, 128 }
 0x109   : > { %p1008_p2 = scmp.ne.s32.totalorder %s517_s1, %s1007_s0  ;;  %s1132_s30 = smov [#allocation11]  }
 0x10a   : > { %s1011_s26 = sshll.u32 %s1132_s30, 4  ;;  %s1012_s26 = int_to_ptr.vmem [resolvable:$false] %s1011_s26 }
 0x10b   : > { %p1009_p10 = pnand %p1008_p2, %p1550_p1  ;;  %s1013_s7 = scalar_lea.vmem %s1012_s26, 256 }
 0x10c   : > { %p1014_p5 = scmp.lt.s32.totalorder %s517_s1, %s1012_s26  ;;  %p1015_p11 = scmp.lt.s32.totalorder %s1013_s7, %s1007_s0 }
 0x10d   : > { %p1010_p3 = pneg %p1009_p10 }
 0x10e   : > { %p1016_p7 = por %p1015_p11, %p1014_p5 }
 0x110   : > { %p1017_p4 = pnand %p1016_p7, %p1010_p3 }
 0x112   : > { %1020 = shalt.err (!%p1017_p4)
}
 0x113   : > { %s1021_s16 = scalar_lea.hbm %s1474_s11, 128  ;;  %s1025_s23 = scalar_lea.hbm %s1530_s5, 256 }
 0x114   : > { %p1022_p13 = scmp.ne.s32.totalorder %s1474_s11, %s1021_s16  ;;  %p1026_p12 = scmp.lt.u32.totalorder %s1474_s11, %s1530_s5 }
 0x115   : > { %p1027_p0 = scmp.lt.u32.totalorder %s1025_s23, %s1021_s16  ;;  %p1029_p2 = scmp.lt.u32.totalorder %s1021_s16, %s1474_s11 }
 0x116   : > { %p1023_p9 = pnand %p1022_p13, %p1550_p1 }
 0x117   : > { %p1028_p8 = por %p1027_p0, %p1026_p12 }
 0x118   : > { %p1024_p6 = pneg %p1023_p9 }
 0x119   : > { %p1030_p10 = por %p1029_p2, %p1028_p8 }
 0x11b   : > { %p1031_p3 = pnand %p1030_p10, %p1024_p6 }
 0x11d   : > { %1034 = shalt.err (!%p1031_p3)
}
 0x11e   : > { %753 = dma.vmem_to_hbm [thread:$0]  (%p1550_p1), %s517_s1, 128, %s1474_s11, %s464_s15  }
 0x11f PF: > { %s528_s29 = sand.u32 1, %s1094_s18   ;;  %p1552_p5 = scmp.ne.s32.totalorder %s1539_s10, 0 }
 0x120   : > { %p1553_p11 = scmp.ge.s32.totalorder %s1122_s25, 2  ;;  %s529_s14 = scalar_lea.sflag [#allocation4], %s528_s29 }
 0x122   : > { %p766_p7 = pnand %p1553_p11, %p1552_p5 }
 0x124   : > { %1080 = dma.done.wait (!%p766_p7), %s529_s14, 128  }
 0x125   : > { %1082 = vsyncadd (!%p766_p7), %s529_s14, 4294967168  ;;  %s1554_s21 = sadd.s32 4294967294, %s1122_s25  }
 0x126   : > { %s537_s17 = sand.u32 1, %s1554_s21  }
 0x127   : > { %s538_s0 = scalar_lea.sflag [#allocation9], %s537_s17 }
 0x128   : > { %1084 = dma.done.wait (!%p766_p7), %s538_s0, 256  }
 0x129   : > { %1086 = vsyncadd (!%p766_p7), %s538_s0, 4294967040  ;;  %s556_s9 = scalar_lea.sflag [#allocation12], %s528_s29 }
 0x12a   : > { %1088 = dma.done.wait (!%p766_p7), %s556_s9, 128  }
 0x12b   : > { %1090 = vsyncadd (!%p766_p7), %s556_s9, 4294967168  ;;  %s31_s25 = sadd.s32 1, %s1122_s25   ;;  %s1555_s18 = smov %s1098_s19 }
 0x12c   : > { %p28_p1 = scmp.ge.s32.totalorder %s31_s25, 4   ;;  %s1556_s19 = smov %s1102_s20 }
 0x12d   : > { %s1557_s20 = smov %s1224_s8  ;;  %s1558_s21 = smov %s1110_s22 }
 0x12e   : > { %s1515_s22 = smov 0   ;;  %s1559_s23 = smov %s1118_s24 }
 0x12f   : > { %s1560_s24 = smov %s1562_s28  ;;  %30 = sbr.rel (!%p28_p1) target bundleno = 16 (0x10), region = 147 }
 0x136   :  { %561 = vsyncpa [#allocation3], 1 }
 0x137   :  { %563 = vsyncpa [#allocation3 + $0x1], 1 }
 0x138   :  { %564 = vsyncpa [#allocation6], 1 }
 0x139   :  { %566 = vsyncpa [#allocation6 + $0x1], 1 }
 0x13a   :  { %567 = vsyncpa [#allocation4], 1 }
 0x13b   :  { %569 = vsyncpa [#allocation4 + $0x1], 1 }
 0x13c   :  { %570 = vsyncpa [#allocation9], 1 }
 0x13d   :  { %572 = vsyncpa [#allocation9 + $0x1], 1 }
 0x13e   :  { %573 = vsyncpa [#allocation12], 1 }
 0x13f   :  { %575 = vsyncpa [#allocation12 + $0x1], 1 }

</bundles_post_ra>
